<compile_context>
chip_gen: v6e
topology: v6e:2x2x1
jax: 0.10.0
libtpu: 0.0.40
codegen_flags: <defaults>
</compile_context>

<pallas_src>
import functools

import numpy as np
import jax
import jax.numpy as jnp
from jax import lax
from jax.experimental import pallas as pl
from jax.experimental.pallas import tpu as pltpu


def _round_up(x, m):
    return (x + m - 1) // m * m


def _device_generation():
    try:
        kind = jax.devices()[0].device_kind.lower()
    except Exception:
        return 6
    if "v7" in kind:
        return 7
    if "v5" in kind:
        return 5
    return 6


# ----------------------------------------------------------------------------
# Pallas kernel: fused LayerNorm (stats only) + Linear, `fold` tokens per row
# ----------------------------------------------------------------------------
def _spt_ln_linear_kernel(x_ref, w_ref, bias_ref, o_ref, *, fold, pd, n_real, eps):
    # x_ref:    (TR, fold*pd)           bf16 tokens, fold tokens packed per row
    # w_ref:    (fold*pd, fold*dim_pad) block-diagonal weight (gamma folded in)
    # bias_ref: (1, fold*dim_pad)       f32 bias (beta @ w + b), tiled fold times
    # o_ref:    (TR, fold*dim_pad)      lane-dense output block (128 lanes)
    inv_n = jnp.float32(1.0 / n_real)
    segs = []
    for j in range(fold):
        xj = x_ref[:, j * pd:(j + 1) * pd].astype(jnp.float32)
        # Single-pass stats in f32; padded lanes are zero so sums are exact,
        # divide by the REAL feature count (n_real), not the padded width.
        s = jnp.sum(xj, axis=-1, keepdims=True)
        ss = jnp.sum(xj * xj, axis=-1, keepdims=True)
        mean = s * inv_n
        var = jnp.maximum(ss * inv_n - mean * mean, 0.0)
        xn = (xj - mean) * lax.rsqrt(var + eps)
        # Padded lanes of xn are nonzero (-mean*rsqrt) but hit zero weight rows.
        segs.append(xn.astype(w_ref.dtype))
    xn_wide = jnp.concatenate(segs, axis=-1) if fold > 1 else segs[0]
    y = jnp.dot(xn_wide, w_ref[...], preferred_element_type=jnp.float32)
    o_ref[...] = (y + bias_ref[...]).astype(o_ref.dtype)


def spt_ln_linear(tokens_wide, w_bd, bias_wide, *, fold, pd, n_real,
                  rows_per_step, eps=1e-5, out_dtype=jnp.float32, gen=6):
    """tokens_wide: (Rw, fold*pd) bf16 -> (Rw, fold*dim_pad)."""
    Rw, width = tokens_wide.shape
    out_w = w_bd.shape[1]
    assert Rw % rows_per_step == 0  # guaranteed by wrapper-side row padding
    grid = (Rw // rows_per_step,)

    # VMEM budget: double-buffered in/out blocks + resident weight/bias +
    # in-kernel f32 temporaries (roughly 2x the bf16 x-block per live temp).
    x_block = rows_per_step * width * tokens_wide.dtype.itemsize
    o_block = rows_per_step * out_w * np.dtype(out_dtype).itemsize
    w_bytes = w_bd.size * w_bd.dtype.itemsize
    budget = 2 * (x_block + o_block) + w_bytes + 8 * x_block + (8 << 20)
    vmem_cap = (56 << 20) if gen == 7 else (100 << 20)
    vmem_limit = int(min(vmem_cap, max(48 << 20, budget)))

    kernel = functools.partial(_spt_ln_linear_kernel, fold=fold, pd=pd,
                               n_real=n_real, eps=eps)
    return pl.pallas_call(
        kernel,
        out_shape=jax.ShapeDtypeStruct((Rw, out_w), out_dtype),
        grid_spec=pltpu.PrefetchScalarGridSpec(
            num_scalar_prefetch=0,
            grid=grid,
            in_specs=[
                pl.BlockSpec((rows_per_step, width), lambda i: (i, 0)),
                pl.BlockSpec((width, out_w), lambda i: (0, 0)),
                pl.BlockSpec((1, out_w), lambda i: (0, 0)),
            ],
            out_specs=pl.BlockSpec((rows_per_step, out_w), lambda i: (i, 0)),
        ),
        compiler_params=pltpu.CompilerParams(
            dimension_semantics=("parallel",),
            vmem_limit_bytes=vmem_limit),
    )(tokens_wide, w_bd, bias_wide)


# ----------------------------------------------------------------------------
# One-time parameter prep: fold LN affine into the Linear, pad, block-diagonal
# ----------------------------------------------------------------------------
def prepare_spt_params(gamma, beta, w, b, *, patch_size, channels, dim):
    p2 = patch_size * patch_size
    c5 = 5 * channels
    pd_raw = p2 * c5
    pd = _round_up(pd_raw, 128)

    # Prefer padding the feature dim by appending zero *channels* (rides along
    # with the token concat for free); fall back to a tail pad otherwise.
    if pd % p2 == 0:
        c5_pad = pd // p2
        tail_pad = 0
    else:
        c5_pad = c5
        tail_pad = pd - pd_raw

    k = jnp.arange(pd_raw)
    dest = (k // c5) * c5_pad + (k % c5)          # identity when c5_pad == c5

    # Pad output dim so the lane-dense path holds for any dim.
    if dim < 128:
        dim_pad = dim
        while 128 % dim_pad != 0:
            dim_pad += 1
    else:
        dim_pad = _round_up(dim, 128)
    fold = 128 // dim_pad if dim_pad <= 128 else 1

    gamma_f = gamma.astype(jnp.float32)
    beta_f = beta.astype(jnp.float32)
    w_f = w.astype(jnp.float32)
    b_f = b.astype(jnp.float32)

    # Fold the LayerNorm affine into the Linear (exact, in f32):
    #   y = ((x-mean)*rsqrt(var+eps)) @ (diag(gamma) @ W) + (beta @ W + b)
    w_eff = gamma_f[:, None] * w_f                 # (pd_raw, dim)
    b_eff = beta_f @ w_f + b_f                     # (dim,)

    w_cols = jnp.pad(w_eff, ((0, 0), (0, dim_pad - dim)))
    b_pad = jnp.pad(b_eff, (0, dim_pad - dim))
    w_pad = jnp.zeros((pd, dim_pad), jnp.float32).at[dest].set(w_cols)

    # Block-diagonal weight: column block j serves token (fold*row + j).
    w_bd = jnp.zeros((fold * pd, fold * dim_pad), jnp.float32)
    for j in range(fold):
        w_bd = w_bd.at[j * pd:(j + 1) * pd,
                       j * dim_pad:(j + 1) * dim_pad].set(w_pad)
    w_bd = w_bd.astype(jnp.bfloat16)
    bias_wide = jnp.tile(b_pad[None, :], (1, fold))

    return dict(w_bd=w_bd, bias=bias_wide,
                pd=pd, pd_raw=pd_raw, c5=c5, c5_pad=c5_pad, tail_pad=tail_pad,
                fold=fold, dim=dim, dim_pad=dim_pad,
                patch_size=patch_size, channels=channels)


# ----------------------------------------------------------------------------
# Glue: shifts + rearrange built directly in token layout (plain JAX, bf16)
# ----------------------------------------------------------------------------
_SHIFTS = ((1, -1, 0, 0), (-1, 1, 0, 0), (0, 0, 1, -1), (0, 0, -1, 1))
# Offsets into a 1-pixel zero-padded image that reproduce torch.F.pad shifts,
# in torch.cat order: center, (1,-1,0,0), (-1,1,0,0), (0,0,1,-1), (0,0,-1,1).
_OFFSETS = ((1, 1), (1, 0), (1, 2), (0, 1), (2, 1))


def spt_forward(x, prep, *, max_tokens_per_step=None, eps=1e-5,
                out_dtype=jnp.float32):
    """x: (B, C, H, W) float32 -> (B, num_patches, dim)."""
    B, C, H, W = x.shape
    p = prep["patch_size"]
    h, w = H // p, W // p
    N = h * w
    R = B * N
    pd, pd_raw = prep["pd"], prep["pd_raw"]
    c5, c5_pad, tail_pad = prep["c5"], prep["c5_pad"], prep["tail_pad"]
    fold, dim, dim_pad = prep["fold"], prep["dim"], prep["dim_pad"]

    gen = _device_generation()
    if max_tokens_per_step is None:
        max_tokens_per_step = {5: 4096, 6: 8192, 7: 8192}.get(gen, 8192)

    # bf16 token stream: one zero-padded copy, 5 offset views (no 4x re-pad).
    xb = x.astype(jnp.bfloat16)
    xp = jnp.pad(xb, ((0, 0), (0, 0), (1, 1), (1, 1)))

    def to_patches(t):                     # (B, C, H, W) -> (B, h, w, p, p, C)
        t = t.reshape(B, C, h, p, w, p)
        return t.transpose(0, 2, 4, 3, 5, 1)

    parts = [to_patches(xp[:, :, r:r + H, c0:c0 + W]) for (r, c0) in _OFFSETS]
    if c5_pad > c5:                        # free feature pad via zero channels
        parts.append(jnp.zeros((B, h, w, p, p, c5_pad - c5), xb.dtype))
    tok = jnp.concatenate(parts, axis=-1)  # (B, h, w, p, p, c5_pad)
    tokens = tok.reshape(R, p * p * c5_pad)
    if tail_pad:
        tokens = jnp.pad(tokens, ((0, 0), (0, tail_pad)))
    # tokens: (R, pd) bf16, padded lanes are zero.

    # Block sizing: bounded over-padding (one 16*fold quantum per step),
    # >= 2 grid steps on v7x so "parallel" uses both TensorCores.
    row_q = 16 * fold                      # bf16 sublane packing => 16 rows
    n_steps = max(1, -(-R // max_tokens_per_step))
    if gen == 7 and R >= 2 * row_q:
        n_steps = max(n_steps, 2)
    tok_block = _round_up(-(-R // n_steps), row_q)
    Rpad = _round_up(R, tok_block)
    if Rpad != R:
        tokens = jnp.pad(tokens, ((0, Rpad - R), (0, 0)))

    # Pack `fold` consecutive tokens per row (pure row-major view) so the
    # kernel's output block is lane-dense (fold*dim_pad == 128 when dim<=128).
    tokens_wide = tokens.reshape(Rpad // fold, fold * pd)

    out_wide = spt_ln_linear(
        tokens_wide, prep["w_bd"], prep["bias"],
        fold=fold, pd=pd, n_real=pd_raw, eps=eps,
        rows_per_step=tok_block // fold, out_dtype=out_dtype, gen=gen)

    out = out_wide.reshape(Rpad, dim_pad)[:R, :dim]   # row-major view back
    return out.reshape(B, N, dim)


# ----------------------------------------------------------------------------
# Pure JAX reference (original, unpadded formulation) for validation
# ----------------------------------------------------------------------------
def _pad_shift(x, pad):
    """torch.nn.functional.pad on NCHW with (left, right, top, bottom)."""
    l, r, t, btm = pad
    _, _, H, W = x.shape
    xpd = jnp.pad(x, ((0, 0), (0, 0),
                      (max(t, 0), max(btm, 0)),
                      (max(l, 0), max(r, 0))))
    h0 = max(-t, 0)
    w0 = max(-l, 0)
    return xpd[:, :, h0:h0 + H, w0:w0 + W]


def spt_reference(x, gamma, beta, w, b, *, patch_size, eps=1e-5):
    B, C, H, W = x.shape
    p = patch_size
    shifted = [_pad_shift(x, s) for s in _SHIFTS]
    x5 = jnp.concatenate([x, *shifted], axis=1)
    C5 = 5 * C
    h, wd = H // p, W // p
    tok = x5.reshape(B, C5, h, p, wd, p).transpose(0, 2, 4, 3, 5, 1)
    tok = tok.reshape(B, h * wd, p * p * C5)
    mean = jnp.mean(tok, axis=-1, keepdims=True)
    var = jnp.mean((tok - mean) ** 2, axis=-1, keepdims=True)
    xn = (tok - mean) / jnp.sqrt(var + eps) * gamma + beta
    return jnp.einsum("bnd,de->bne", xn, w) + b


# ----------------------------------------------------------------------------
if __name__ == "__main__":
    # B=2, channels=3, 16x16 image, patch_size=4 => patch_dim=240, 16 patches,
    # dim=32 (so fold=4 and the kernel output block is 128 lanes wide).
    B, C, H, W = 2, 3, 16, 16
    patch_size = 4
    dim = 32
    pd_raw = patch_size * patch_size * 5 * C        # 240

    key = jax.random.PRNGKey(0)
    kx, kw, kg, kb = jax.random.split(key, 4)
    x = jax.random.normal(kx, (B, C, H, W), dtype=jnp.float32)

    gamma = 1.0 + 0.1 * jax.random.normal(kg, (pd_raw,), jnp.float32)
    beta = 0.1 * jax.random.normal(kb, (pd_raw,), jnp.float32)
    w = 0.02 * jax.random.normal(kw, (pd_raw, dim), jnp.float32)
    b = 0.05 * jnp.ones((dim,), jnp.float32)

    prep = prepare_spt_params(gamma, beta, w, b,
                              patch_size=patch_size, channels=C, dim=dim)

    out = jax.block_until_ready(spt_forward(x, prep))
    N = (H // patch_size) * (W // patch_size)
    assert out.shape == (B, N, dim)

    ref = spt_reference(x, gamma, beta, w, b, patch_size=patch_size)
    max_err = float(jnp.max(jnp.abs(out - ref)))
    # bf16 tokens + bf16 MXU operands (f32 stats/accum): expected err ~1e-3.
    assert jnp.allclose(out, ref, atol=2e-2, rtol=2e-2), f"max err {max_err}"

    print("KERNEL_OK")
</pallas_src>

<mosaic_0001>
module attributes {stable_mosaic.version = 11 : i64} {
  func.func @_spt_ln_linear_kernel(%arg0: i32, %arg1: memref<16x1024xbf16, #tpu.memory_space<vmem>>, %arg2: memref<1024x128xbf16, #tpu.memory_space<vmem>>, %arg3: memref<1x128xf32, #tpu.memory_space<vmem>>, %arg4: memref<16x128xf32, #tpu.memory_space<vmem>>) attributes {dimension_semantics = [#tpu.dimension_semantics<parallel>], iteration_bounds = array<i64: 1>, scalar_prefetch = 0 : i64, scratch_operands = 0 : i64, tpu.core_type = #tpu.core_type<tc>, window_params = [{transform_indices = @transform_0, window_bounds = array<i64: 16, 1024>}, {pipeline_mode = #tpu.pipeline_mode<synchronous>, transform_indices = @transform_1, window_bounds = array<i64: 1024, 128>}, {pipeline_mode = #tpu.pipeline_mode<synchronous>, transform_indices = @transform_2, window_bounds = array<i64: 1, 128>}, {transform_indices = @transform_3, window_bounds = array<i64: 16, 128>}]} {
    %c0 = arith.constant 0 : index
    %c0_0 = arith.constant 0 : index
    %0 = vector.load %arg1[%c0, %c0_0] : memref<16x1024xbf16, #tpu.memory_space<vmem>>, vector<16x256xbf16>
    %1 = arith.extf %0 : vector<16x256xbf16> to vector<16x256xf32>
    %cst = arith.constant dense<0.000000e+00> : vector<16xf32>
    %2 = vector.multi_reduction <add>, %1, %cst [1] : vector<16x256xf32> to vector<16xf32>
    %3 = vector.shape_cast %2 : vector<16xf32> to vector<16x1xf32>
    %4 = arith.mulf %1, %1 : vector<16x256xf32>
    %cst_1 = arith.constant dense<0.000000e+00> : vector<16xf32>
    %5 = vector.multi_reduction <add>, %4, %cst_1 [1] : vector<16x256xf32> to vector<16xf32>
    %6 = vector.shape_cast %5 : vector<16xf32> to vector<16x1xf32>
    %cst_2 = arith.constant 0.00416666688 : f32
    %7 = vector.broadcast %cst_2 : f32 to vector<16x1xf32>
    %8 = arith.mulf %3, %7 : vector<16x1xf32>
    %cst_3 = arith.constant 0.00416666688 : f32
    %9 = vector.broadcast %cst_3 : f32 to vector<16x1xf32>
    %10 = arith.mulf %6, %9 : vector<16x1xf32>
    %11 = arith.mulf %8, %8 : vector<16x1xf32>
    %12 = arith.subf %10, %11 : vector<16x1xf32>
    %cst_4 = arith.constant 0.000000e+00 : f32
    %13 = vector.broadcast %cst_4 : f32 to vector<16x1xf32>
    %14 = arith.maximumf %12, %13 : vector<16x1xf32>
    %15 = vector.broadcast %8 : vector<16x1xf32> to vector<16x256xf32>
    %16 = arith.subf %1, %15 : vector<16x256xf32>
    %cst_5 = arith.constant 9.99999974E-6 : f32
    %17 = vector.broadcast %cst_5 : f32 to vector<16x1xf32>
    %18 = arith.addf %14, %17 : vector<16x1xf32>
    %19 = math.rsqrt %18 : vector<16x1xf32>
    %20 = vector.broadcast %19 : vector<16x1xf32> to vector<16x256xf32>
    %21 = arith.mulf %16, %20 : vector<16x256xf32>
    %22 = arith.truncf %21 : vector<16x256xf32> to vector<16x256xbf16>
    %c0_6 = arith.constant 0 : index
    %c256 = arith.constant 256 : index
    %23 = vector.load %arg1[%c0_6, %c256] : memref<16x1024xbf16, #tpu.memory_space<vmem>>, vector<16x256xbf16>
    %24 = arith.extf %23 : vector<16x256xbf16> to vector<16x256xf32>
    %cst_7 = arith.constant dense<0.000000e+00> : vector<16xf32>
    %25 = vector.multi_reduction <add>, %24, %cst_7 [1] : vector<16x256xf32> to vector<16xf32>
    %26 = vector.shape_cast %25 : vector<16xf32> to vector<16x1xf32>
    %27 = arith.mulf %24, %24 : vector<16x256xf32>
    %cst_8 = arith.constant dense<0.000000e+00> : vector<16xf32>
    %28 = vector.multi_reduction <add>, %27, %cst_8 [1] : vector<16x256xf32> to vector<16xf32>
    %29 = vector.shape_cast %28 : vector<16xf32> to vector<16x1xf32>
    %cst_9 = arith.constant 0.00416666688 : f32
    %30 = vector.broadcast %cst_9 : f32 to vector<16x1xf32>
    %31 = arith.mulf %26, %30 : vector<16x1xf32>
    %cst_10 = arith.constant 0.00416666688 : f32
    %32 = vector.broadcast %cst_10 : f32 to vector<16x1xf32>
    %33 = arith.mulf %29, %32 : vector<16x1xf32>
    %34 = arith.mulf %31, %31 : vector<16x1xf32>
    %35 = arith.subf %33, %34 : vector<16x1xf32>
    %cst_11 = arith.constant 0.000000e+00 : f32
    %36 = vector.broadcast %cst_11 : f32 to vector<16x1xf32>
    %37 = arith.maximumf %35, %36 : vector<16x1xf32>
    %38 = vector.broadcast %31 : vector<16x1xf32> to vector<16x256xf32>
    %39 = arith.subf %24, %38 : vector<16x256xf32>
    %cst_12 = arith.constant 9.99999974E-6 : f32
    %40 = vector.broadcast %cst_12 : f32 to vector<16x1xf32>
    %41 = arith.addf %37, %40 : vector<16x1xf32>
    %42 = math.rsqrt %41 : vector<16x1xf32>
    %43 = vector.broadcast %42 : vector<16x1xf32> to vector<16x256xf32>
    %44 = arith.mulf %39, %43 : vector<16x256xf32>
    %45 = arith.truncf %44 : vector<16x256xf32> to vector<16x256xbf16>
    %c0_13 = arith.constant 0 : index
    %c512 = arith.constant 512 : index
    %46 = vector.load %arg1[%c0_13, %c512] : memref<16x1024xbf16, #tpu.memory_space<vmem>>, vector<16x256xbf16>
    %47 = arith.extf %46 : vector<16x256xbf16> to vector<16x256xf32>
    %cst_14 = arith.constant dense<0.000000e+00> : vector<16xf32>
    %48 = vector.multi_reduction <add>, %47, %cst_14 [1] : vector<16x256xf32> to vector<16xf32>
    %49 = vector.shape_cast %48 : vector<16xf32> to vector<16x1xf32>
    %50 = arith.mulf %47, %47 : vector<16x256xf32>
    %cst_15 = arith.constant dense<0.000000e+00> : vector<16xf32>
    %51 = vector.multi_reduction <add>, %50, %cst_15 [1] : vector<16x256xf32> to vector<16xf32>
    %52 = vector.shape_cast %51 : vector<16xf32> to vector<16x1xf32>
    %cst_16 = arith.constant 0.00416666688 : f32
    %53 = vector.broadcast %cst_16 : f32 to vector<16x1xf32>
    %54 = arith.mulf %49, %53 : vector<16x1xf32>
    %cst_17 = arith.constant 0.00416666688 : f32
    %55 = vector.broadcast %cst_17 : f32 to vector<16x1xf32>
    %56 = arith.mulf %52, %55 : vector<16x1xf32>
    %57 = arith.mulf %54, %54 : vector<16x1xf32>
    %58 = arith.subf %56, %57 : vector<16x1xf32>
    %cst_18 = arith.constant 0.000000e+00 : f32
    %59 = vector.broadcast %cst_18 : f32 to vector<16x1xf32>
    %60 = arith.maximumf %58, %59 : vector<16x1xf32>
    %61 = vector.broadcast %54 : vector<16x1xf32> to vector<16x256xf32>
    %62 = arith.subf %47, %61 : vector<16x256xf32>
    %cst_19 = arith.constant 9.99999974E-6 : f32
    %63 = vector.broadcast %cst_19 : f32 to vector<16x1xf32>
    %64 = arith.addf %60, %63 : vector<16x1xf32>
    %65 = math.rsqrt %64 : vector<16x1xf32>
    %66 = vector.broadcast %65 : vector<16x1xf32> to vector<16x256xf32>
    %67 = arith.mulf %62, %66 : vector<16x256xf32>
    %68 = arith.truncf %67 : vector<16x256xf32> to vector<16x256xbf16>
    %c0_20 = arith.constant 0 : index
    %c768 = arith.constant 768 : index
    %69 = vector.load %arg1[%c0_20, %c768] : memref<16x1024xbf16, #tpu.memory_space<vmem>>, vector<16x256xbf16>
    %70 = arith.extf %69 : vector<16x256xbf16> to vector<16x256xf32>
    %cst_21 = arith.constant dense<0.000000e+00> : vector<16xf32>
    %71 = vector.multi_reduction <add>, %70, %cst_21 [1] : vector<16x256xf32> to vector<16xf32>
    %72 = vector.shape_cast %71 : vector<16xf32> to vector<16x1xf32>
    %73 = arith.mulf %70, %70 : vector<16x256xf32>
    %cst_22 = arith.constant dense<0.000000e+00> : vector<16xf32>
    %74 = vector.multi_reduction <add>, %73, %cst_22 [1] : vector<16x256xf32> to vector<16xf32>
    %75 = vector.shape_cast %74 : vector<16xf32> to vector<16x1xf32>
    %cst_23 = arith.constant 0.00416666688 : f32
    %76 = vector.broadcast %cst_23 : f32 to vector<16x1xf32>
    %77 = arith.mulf %72, %76 : vector<16x1xf32>
    %cst_24 = arith.constant 0.00416666688 : f32
    %78 = vector.broadcast %cst_24 : f32 to vector<16x1xf32>
    %79 = arith.mulf %75, %78 : vector<16x1xf32>
    %80 = arith.mulf %77, %77 : vector<16x1xf32>
    %81 = arith.subf %79, %80 : vector<16x1xf32>
    %cst_25 = arith.constant 0.000000e+00 : f32
    %82 = vector.broadcast %cst_25 : f32 to vector<16x1xf32>
    %83 = arith.maximumf %81, %82 : vector<16x1xf32>
    %84 = vector.broadcast %77 : vector<16x1xf32> to vector<16x256xf32>
    %85 = arith.subf %70, %84 : vector<16x256xf32>
    %cst_26 = arith.constant 9.99999974E-6 : f32
    %86 = vector.broadcast %cst_26 : f32 to vector<16x1xf32>
    %87 = arith.addf %83, %86 : vector<16x1xf32>
    %88 = math.rsqrt %87 : vector<16x1xf32>
    %89 = vector.broadcast %88 : vector<16x1xf32> to vector<16x256xf32>
    %90 = arith.mulf %85, %89 : vector<16x256xf32>
    %91 = arith.truncf %90 : vector<16x256xf32> to vector<16x256xbf16>
    %92 = tpu.concatenate %22, %45, %68, %91 in 1 : vector<16x256xbf16>, vector<16x256xbf16>, vector<16x256xbf16>, vector<16x256xbf16> -> vector<16x1024xbf16>
    %c0_27 = arith.constant 0 : index
    %c0_28 = arith.constant 0 : index
    %93 = vector.load %arg2[%c0_27, %c0_28] : memref<1024x128xbf16, #tpu.memory_space<vmem>>, vector<1024x128xbf16>
    %cst_29 = arith.constant dense<0.000000e+00> : vector<16x128xf32>
    %94 = tpu.matmul %92, %93, %cst_29 {dimension_numbers = #tpu.dot_dimension_numbers<[1], [0], [0], [1], [0, 0, 1, 1], [], []>} : vector<16x1024xbf16>, vector<1024x128xbf16>, vector<16x128xf32> -> vector<16x128xf32>
    %c0_30 = arith.constant 0 : index
    %c0_31 = arith.constant 0 : index
    %95 = vector.load %arg3[%c0_30, %c0_31] : memref<1x128xf32, #tpu.memory_space<vmem>>, vector<1x128xf32>
    %96 = vector.broadcast %95 : vector<1x128xf32> to vector<16x128xf32>
    %97 = arith.addf %94, %96 : vector<16x128xf32>
    %c0_32 = arith.constant 0 : index
    %c0_33 = arith.constant 0 : index
    %98 = vector.load %arg4[%c0_32, %c0_33] : memref<16x128xf32, #tpu.memory_space<vmem>>, vector<16x128xf32>
    tpu.vector_store %arg4[%c0_32, %c0_33], %97 {strides = array<i32>} : memref<16x128xf32, #tpu.memory_space<vmem>>, vector<16x128xf32>,
    return
  }
  func.func @transform_0(%arg0: i32) -> (i32, i32) {
    %c0_i32 = arith.constant 0 : i32
    %c0_i32_0 = arith.constant 0 : i32
    return %arg0, %c0_i32 : i32, i32
  }
  func.func @transform_1(%arg0: i32) -> (i32, i32) {
    %c0_i32 = arith.constant 0 : i32
    %c0_i32_0 = arith.constant 0 : i32
    %c0_i32_1 = arith.constant 0 : i32
    return %c0_i32, %c0_i32_0 : i32, i32
  }
  func.func @transform_2(%arg0: i32) -> (i32, i32) {
    %c0_i32 = arith.constant 0 : i32
    %c0_i32_0 = arith.constant 0 : i32
    %c0_i32_1 = arith.constant 0 : i32
    return %c0_i32, %c0_i32_0 : i32, i32
  }
  func.func @transform_3(%arg0: i32) -> (i32, i32) {
    %c0_i32 = arith.constant 0 : i32
    %c0_i32_0 = arith.constant 0 : i32
    return %arg0, %c0_i32 : i32, i32
  }
}

</mosaic_0001>

<bundles_post_ra>
// kernel: tpu_custom_call.1
= control target key start
LH: loop header
LB: loop body
LE: loop exit
PB: predicated region body
PF: predicated region fallthrough
CT: control target
= control target key end

     0   :  { %8 = vsyncpa [#allocation3], 0  ;;  %s1424_s0 = inlined_call_operand.hbm [shape: bf16[16,1024], index: 0, kind: input, shape index: {}]   ;;  %s1425_s1 = inlined_call_operand.hbm [shape: bf16[1024,128], index: 1, kind: input, shape index: {}]   ;;  %s1426_s2 = inlined_call_operand.vmem [shape: f32[1,128], index: 2, kind: input, shape index: {}]   ;;  %s1427_s3 = inlined_call_operand.hbm [shape: f32[16,128], index: 3, kind: output, shape index: {}]  }
   0x1   :  { %9 = vsyncpa [#allocation6], 0 }
   0x2   :  { %10 = vsyncpa [#allocation4], 0  ;;  %s1239_s12 = smov [#allocation2]  }
   0x3   :  { %s16_s13 = sshll.u32 %s1239_s12, 4  ;;  %s17_s13 = int_to_ptr.vmem [resolvable:$true] %s16_s13 }
   0x4   :  { %s1181_s14 = scalar_lea.vmem %s17_s13, 1024  ;;  %p1186_p1 = scmp.lt.s32.totalorder %s17_s13, %s17_s13 }
   0x5   :  { %p1182_p0 = scmp.ne.s32.totalorder %s17_s13, %s1181_s14  ;;  %p1187_p2 = scmp.lt.s32.totalorder %s1181_s14, %s1181_s14 }
   0x7   :  { %p1188_p3 = por %p1187_p2, %p1186_p1 }
   0x9   :  { %p1189_p4 = pnand %p1188_p3, %p1182_p0 }
   0xb   :  { %1192 = shalt.err (!%p1189_p4)
}
   0xc   :  { %s1240_s15 = smov 512   ;;  %s1241_s16 = smov 32  }
   0xd   :  { %22 = dma.hbm_to_vmem [thread:$0]  %s1424_s0, 1024, %s17_s13, [#allocation3], %s1240_s15, %s1240_s15, %s1241_s16  }
   0xe   :  { %s1242_s19 = smov [#allocation5]  }
   0xf   :  { %s28_s20 = sshll.u32 %s1242_s19, 4  ;;  %s29_s20 = int_to_ptr.vmem [resolvable:$true] %s28_s20 }
  0x10   :  { %s1201_s21 = scalar_lea.vmem %s29_s20, 8192  ;;  %p1206_p6 = scmp.lt.s32.totalorder %s29_s20, %s29_s20 }
  0x11   :  { %p1202_p5 = scmp.ne.s32.totalorder %s29_s20, %s1201_s21  ;;  %p1207_p7 = scmp.lt.s32.totalorder %s1201_s21, %s1201_s21 }
  0x13   :  { %p1208_p8 = por %p1207_p7, %p1206_p6 }
  0x15   :  { %p1209_p9 = pnand %p1208_p8, %p1202_p5 }
  0x17   :  { %1212 = shalt.err (!%p1209_p9)
}
  0x18   :  { %s1243_s22 = smov 64   ;;  %s1244_s23 = smov 4  }
  0x19   :  { %34 = dma.hbm_to_vmem [thread:$0]  %s1425_s1, 8192, %s29_s20, [#allocation6], %s1243_s22, %s1243_s22, %s1244_s23  }
  0x1a   :  { %1233 = dma.done.wait [#allocation3], 1024  }
  0x1b   :  { %1234 = vsyncadd [#allocation3], 4294966272 }
  0x1c   :  { %1235 = dma.done.wait [#allocation6], 8192  }
  0x1d   :  { %1236 = vsyncadd [#allocation6], 4294959104  ;;  %v91_v0 = vld [vmem:[#allocation2 + $0x28] sm:$0xff]  ;;  %v44_v1 = vld [vmem:[#allocation2] sm:$0xff] }
  0x1e   :  { %v45_v2 = vld [vmem:[#allocation2 + $0x20] sm:$0xff]  ;;  %v1274_v3 = vunpack.c.l.bf16 %v91_v0  ;;  %v1276_v4 = vunpack.c.h.bf16 %v91_v0  ;;  %v1278_v5 = vunpack.c.l.bf16 %v44_v1  ;;  %v1280_v6 = vunpack.c.h.bf16 %v44_v1  ;;  %v90_v7 = vld [vmem:[#allocation2 + $0x8] sm:$0xff]  ;;  %v137_v20 = vld [vmem:[#allocation2 + $0x30] sm:$0xff] }
  0x1f   :  { %v1282_v8 = vunpack.c.l.bf16 %v45_v2  ;;  %v1284_v9 = vunpack.c.h.bf16 %v45_v2  ;;  %v1296_v15 = vunpack.c.l.bf16 %v90_v7  ;;  %v1298_v16 = vunpack.c.h.bf16 %v90_v7  ;;  %v136_v24 = vld [vmem:[#allocation2 + $0x10] sm:$0xff]  ;;  %v183_v34 = vld [vmem:[#allocation2 + $0x38] sm:$0xff]  ;;  %v1099_v54 = vld [vmem:[#allocation5 + $0x68] sm:$0xff]  }
  0x20   :  { %v99_v10 = vadd.f32 %v1276_v4, %v1274_v3  ;;  %v50_v11 = vadd.f32 %v1280_v6, %v1278_v5  ;;  %v56_v12 = vmul.f32 %v1278_v5, %v1278_v5  ;;  %v57_v13 = vmul.f32 %v1280_v6, %v1280_v6  ;;  %v1093_v35 = vld [vmem:[#allocation5 + $0x78] sm:$0xff]   ;;  %v1095_v44 = vld [vmem:[#allocation5 + $0x70] sm:$0xff]   ;;  %v1101_v59 = vld [vmem:[#allocation5 + $0x28] sm:$0xff]  }
  0x21   :  { %v53_v14 = vadd.f32 %v1284_v9, %v1282_v8  ;;  %v58_v18 = vmul.f32 %v1282_v8, %v1282_v8  ;;  %v59_v19 = vmul.f32 %v1284_v9, %v1284_v9  ;;  %v96_v21 = vadd.f32 %v1298_v16, %v1296_v15  ;;  %v182_v39 = vld [vmem:[#allocation2 + $0x18] sm:$0xff]  ;;  %996 = vmatprep.subr.bf16.mxu0 %v1093_v35  ;;  %v1097_v48 = vld [vmem:[#allocation5 + $0x30] sm:$0xff]   ;;  %v1103_v0 = vld [vmem:[#allocation5 + $0x60] sm:$0xff]  }
  0x22   :  { %100 = vadd.xlane.f32.xlu1 %v99_v10  ;;  %51 = vadd.xlane.f32.xlu0 %v50_v11  ;;  %v60_v17 = vadd.f32 %v57_v13, %v56_v12  ;;  %v104_v22 = vmul.f32 %v1274_v3, %v1274_v3  ;;  %v105_v23 = vmul.f32 %v1276_v4, %v1276_v4  ;;  %v1314_v28 = vunpack.c.l.bf16 %v137_v20  ;;  %v1094_v40 = vld [vmem:[#allocation5 + $0x38] sm:$0xff]   ;;  %v1100_v55 = vld [vmem:[#allocation5 + $0xf0] sm:$0xff]   ;;  %v1104_v1 = vld [vmem:[#allocation5 + $0xe8] sm:$0xff]  }
  0x23   :  { %v63_v25 = vadd.f32 %v59_v19, %v58_v18  ;;  %v102_v26 = vmul.f32 %v1296_v15, %v1296_v15  ;;  %v103_v27 = vmul.f32 %v1298_v16, %v1298_v16  ;;  %v1316_v29 = vunpack.c.h.bf16 %v137_v20  ;;  %997 = vmatpush3.bf16.msra.mxu0 %v1094_v40  ;;  %v1096_v45 = vld [vmem:[#allocation5 + $0xf8] sm:$0xff]   ;;  %v1102_v60 = vld [vmem:[#allocation5 + $0xb0] sm:$0xff]   ;;  %v1105_v10 = vld [vmem:[#allocation5 + $0x20] sm:$0xff]  }
  0x24   :  { %v109_v30 = vadd.f32 %v105_v23, %v104_v22  ;;  %v1318_v32 = vunpack.c.l.bf16 %v136_v24  ;;  %v1320_v33 = vunpack.c.h.bf16 %v136_v24  ;;  %v150_v37 = vmul.f32 %v1314_v28, %v1314_v28  ;;  %v1098_v49 = vld [vmem:[#allocation5 + $0xb8] sm:$0xff]   ;;  %998 = vmatprep.subr.bf16.mxu0 %v1095_v44  ;;  %1018 = vmatprep.subr.bf16.mxu1 %v1096_v45  ;;  %v1106_v11 = vld [vmem:[#allocation5 + $0xa8] sm:$0xff]   ;;  %v1108_v13 = vld [vmem:[#allocation5 + $0xe0] sm:$0xff]  }
  0x25   :  { %v106_v31 = vadd.f32 %v103_v27, %v102_v26  ;;  %v145_v36 = vadd.f32 %v1316_v29, %v1314_v28  ;;  %v151_v38 = vmul.f32 %v1316_v29, %v1316_v29  ;;  %v1334_v46 = vunpack.c.l.bf16 %v183_v34  ;;  %1019 = vmatpush3.bf16.msra.mxu1 %v1098_v49  ;;  %v1107_v12 = vld [vmem:[#allocation5 + $0x58] sm:$0xff]   ;;  %v1111_v18 = vld [vmem:[#allocation5 + $0x50] sm:$0xff]   ;;  %v1115_v22 = vld [vmem:[#allocation5 + $0x48] sm:$0xff]  }
  0x26   :  { %61 = vadd.xlane.f32.xlu1 %v60_v17  ;;  %54 = vadd.xlane.f32.xlu0 %v53_v14  ;;  %v142_v41 = vadd.f32 %v1320_v33, %v1318_v32  ;;  %v148_v42 = vmul.f32 %v1318_v32, %v1318_v32  ;;  %v149_v43 = vmul.f32 %v1320_v33, %v1320_v33  ;;  %v1336_v47 = vunpack.c.h.bf16 %v183_v34  ;;  %v1109_v14 = vld [vmem:[#allocation5 + $0x18] sm:$0xff]   ;;  %v1110_v17 = vld [vmem:[#allocation5 + $0xa0] sm:$0xff]   ;;  %v1113_v20 = vld [vmem:[#allocation5 + $0x10] sm:$0xff]  }
  0x27   :  { %v155_v50 = vadd.f32 %v151_v38, %v150_v37  ;;  %v1338_v52 = vunpack.c.l.bf16 %v182_v39  ;;  %v1340_v53 = vunpack.c.h.bf16 %v182_v39  ;;  %999 = vmatpush3.bf16.msra.mxu0 %v1097_v48  ;;  %v196_v57 = vmul.f32 %v1334_v46, %v1334_v46  ;;  %1020 = vmatprep.subr.bf16.mxu1 %v1100_v55  ;;  %v1112_v19 = vld [vmem:[#allocation5 + $0xd8] sm:$0xff]   ;;  %v1116_v23 = vld [vmem:[#allocation5 + $0xd0] sm:$0xff]   ;;  %v1117_v24 = vld [vmem:[#allocation5 + $0x8] sm:$0xff]  }
  0x28   :  { %v152_v51 = vadd.f32 %v149_v43, %v148_v42  ;;  %v191_v56 = vadd.f32 %v1336_v47, %v1334_v46  ;;  %v197_v58 = vmul.f32 %v1336_v47, %v1336_v47  ;;  %1000 = vmatprep.subr.bf16.mxu0 %v1099_v54  ;;  %v1119_v26 = vld [vmem:[#allocation5 + $0x40] sm:$0xff]   ;;  %v1120_v27 = vld [vmem:[#allocation5 + $0xc8] sm:$0xff]   ;;  %v1124_v35 = vld [vmem:[#allocation5 + $0x178] sm:$0xff]  }
  0x29   :  { %v188_v61 = vadd.f32 %v1340_v53, %v1338_v52  ;;  %v194_v62 = vmul.f32 %v1338_v52, %v1338_v52  ;;  %v195_v63 = vmul.f32 %v1340_v53, %v1340_v53  ;;  %1021 = vmatpush3.bf16.msra.mxu1 %v1102_v60  ;;  %v1123_v34 = vld [vmem:[#allocation5 + $0xc0] sm:$0xff]   ;;  %v1128_v37 = vld [vmem:[#allocation5 + $0x1f8] sm:$0xff]  }
  0x2a   :  { %64 = vadd.xlane.f32.xlu1 %v63_v25  ;;  %97 = vadd.xlane.f32.xlu0 %v96_v21  ;;  %v201_v2 = vadd.f32 %v197_v58, %v196_v57  ;;  %v1114_v21 = vld [vmem:[#allocation5 + $0x98] sm:$0xff]   ;;  %v1118_v25 = vld [vmem:[#allocation5 + $0x90] sm:$0xff]  }
  0x2b   :  { %1001 = vmatpush3.bf16.msra.mxu0 %v1101_v59  ;;  %v198_v7 = vadd.f32 %v195_v63, %v194_v62  ;;  %1022 = vmatprep.subr.bf16.mxu1 %v1104_v1 }
  0x2c   :  { %1002 = vmatprep.subr.bf16.mxu0 %v1103_v0 }
  0x2d   :  { %1023 = vmatpush3.bf16.msra.mxu1 %v1106_v11 }
  0x2e   :  { %110 = vadd.xlane.f32.xlu1 %v109_v30  ;;  %107 = vadd.xlane.f32.xlu0 %v106_v31  ;;  %v1121_v30 = vld [vmem:[#allocation5] sm:$0xff]   ;;  %v1122_v31 = vld [vmem:[#allocation5 + $0x88] sm:$0xff]  }
  0x2f   :  { %1003 = vmatpush3.bf16.msra.mxu0 %v1105_v10  ;;  %1024 = vmatprep.subr.bf16.mxu1 %v1108_v13 }
  0x30   :  { %1004 = vmatprep.subr.bf16.mxu0 %v1107_v12 }
  0x31   :  { %1025 = vmatpush3.bf16.msra.mxu1 %v1110_v17 }
  0x32   :  { %146 = vadd.xlane.f32.xlu1 %v145_v36  ;;  %143 = vadd.xlane.f32.xlu0 %v142_v41  ;;  %v1125_v36 = vld [vmem:[#allocation5 + $0x80] sm:$0xff]  }
  0x33   :  { %1005 = vmatpush3.bf16.msra.mxu0 %v1109_v14  ;;  %1026 = vmatprep.subr.bf16.mxu1 %v1112_v19 }
  0x34   :  { %1006 = vmatprep.subr.bf16.mxu0 %v1111_v18 }
  0x35   :  { %1027 = vmatpush3.bf16.msra.mxu1 %v1114_v21 }
  0x36   :  { %156 = vadd.xlane.f32.xlu1 %v155_v50  ;;  %153 = vadd.xlane.f32.xlu0 %v152_v51 }
  0x37   :  { %1007 = vmatpush3.bf16.msra.mxu0 %v1113_v20  ;;  %1028 = vmatprep.subr.bf16.mxu1 %v1116_v23 }
  0x38   :  { %1008 = vmatprep.subr.bf16.mxu0 %v1115_v22 }
  0x39   :  { %1029 = vmatpush3.bf16.msra.mxu1 %v1118_v25 }
  0x3a   :  { %192 = vadd.xlane.f32.xlu1 %v191_v56  ;;  %189 = vadd.xlane.f32.xlu0 %v188_v61 }
  0x3b   :  { %1009 = vmatpush3.bf16.msra.mxu0 %v1117_v24  ;;  %1030 = vmatprep.subr.bf16.mxu1 %v1120_v27 }
  0x3c   :  { %1010 = vmatprep.subr.bf16.mxu0 %v1119_v26 }
  0x3d   :  { %1031 = vmatpush3.bf16.msra.mxu1 %v1122_v31 }
  0x3e   :  { %202 = vadd.xlane.f32.xlu1 %v201_v2  ;;  %199 = vadd.xlane.f32.xlu0 %v198_v7 }
  0x3f   :  { %1011 = vmatpush3.bf16.msra.mxu0 %v1121_v30  ;;  %1032 = vmatprep.subr.bf16.mxu1 %v1123_v34 }
  0x40   :  { %1040 = vmatprep.subr.bf16.mxu0 %v1124_v35 }
  0x41   :  { %1033 = vmatpush3.bf16.msra.mxu1 %v1125_v36 }
  0x42   :  { %1062 = vmatprep.subr.bf16.mxu1 %v1128_v37 }
  0xab   :  { %v101_v38 = vpop.xlane.xlu1 %100  ;;  %v52_v39 = vpop.xlane.xlu0 %51 }
  0xac   :  { %v1354_v40 = vmul.f32 0.004166667, %v52_v39  ;;  %v1360_v49 = vmul.f32 0.004166667, %v101_v38 }
  0xae   :  { %v70_v44 = vmul.f32 %v1354_v40, %v1354_v40  ;;  %v117_v60 = vmul.f32 %v1360_v49, %v1360_v49 }
  0xaf   :  { %v62_v41 = vpop.xlane.xlu1 %61  ;;  %v55_v42 = vpop.xlane.xlu0 %54 }
  0xb0   :  { %v68_v43 = vmul.f32 0.004166667, %v62_v41  ;;  %v1358_v45 = vmul.f32 0.004166667, %v55_v42  ;;  %v76_v42 = vsub.f32 %v1278_v5, %v1354_v40 }
  0xb2   :  { %v72_v48 = vsub.f32 %v68_v43, %v70_v44  ;;  %v71_v56 = vmul.f32 %v1358_v45, %v1358_v45  ;;  %v79_v5 = vsub.f32 %v1284_v9, %v1358_v45 }
  0xb3   :  { %v65_v50 = vpop.xlane.xlu1 %64  ;;  %v98_v51 = vpop.xlane.xlu0 %97 }
  0xb4   :  { %v74_v54 = vmax.f32 %v72_v48, 0.0  ;;  %v69_v55 = vmul.f32 0.004166667, %v65_v50  ;;  %v1364_v57 = vmul.f32 0.004166667, %v98_v51  ;;  %v78_v48 = vsub.f32 %v1282_v8, %v1358_v45 }
  0xb6   :  { %v80_v58 = vadd.f32 1e-05, %v74_v54  ;;  %v73_v59 = vsub.f32 %v69_v55, %v71_v56  ;;  %v116_v1 = vmul.f32 %v1364_v57, %v1364_v57  ;;  %v77_v56 = vsub.f32 %v1280_v6, %v1354_v40 }
  0xb7   :  { %v111_v61 = vpop.xlane.xlu1 %110  ;;  %v108_v62 = vpop.xlane.xlu0 %107  ;;  %v125_v6 = vsub.f32 %v1276_v4, %v1360_v49  ;;  %v122_v45 = vsub.f32 %v1296_v15, %v1364_v57 }
  0xb8   :  { %v75_v63 = vmax.f32 %v73_v59, 0.0  ;;  %v115_v0 = vmul.f32 0.004166667, %v111_v61  ;;  %v114_v2 = vmul.f32 0.004166667, %v108_v62  ;;  %1157 = vrsqrt.f32 %v80_v58 }
  0xba   :  { %v81_v7 = vadd.f32 1e-05, %v75_v63  ;;  %v119_v10 = vsub.f32 %v115_v0, %v117_v60  ;;  %v118_v11 = vsub.f32 %v114_v2, %v116_v1  ;;  %v124_v2 = vsub.f32 %v1274_v3, %v1360_v49 }
  0xbb   :  { %v147_v12 = vpop.xlane.xlu1 %146  ;;  %v144_v13 = vpop.xlane.xlu0 %143 }
  0xbc   :  { %1159 = vrsqrt.f32 %v81_v7  ;;  %v121_v14 = vmax.f32 %v119_v10, 0.0  ;;  %v120_v17 = vmax.f32 %v118_v11, 0.0  ;;  %v1370_v18 = vmul.f32 0.004166667, %v147_v12  ;;  %v1126_v12 = vld [vmem:[#allocation5 + $0x138] sm:$0xff]  }
  0xbd   :  { %v1372_v19 = vmul.f32 0.004166667, %v144_v13  ;;  %v123_v13 = vsub.f32 %v1298_v16, %v1364_v57  ;;  %v1132_v16 = vld [vmem:[#allocation5 + $0x1f0] sm:$0xff]  }
  0xbe   :  { %v127_v20 = vadd.f32 1e-05, %v121_v14  ;;  %v126_v21 = vadd.f32 1e-05, %v120_v17  ;;  %v163_v22 = vmul.f32 %v1370_v18, %v1370_v18  ;;  %v1127_v14 = vld [vmem:[#allocation5 + $0x170] sm:$0xff]   ;;  %v171_v57 = vsub.f32 %v1316_v29, %v1370_v18 }
  0xbf   :  { %v157_v23 = vpop.xlane.xlu1 %156  ;;  %v162_v24 = vmul.f32 %v1372_v19, %v1372_v19  ;;  %v154_v25 = vpop.xlane.xlu0 %153 }
  0xc0   :  { %1161 = vrsqrt.f32 %v127_v20  ;;  %v161_v26 = vmul.f32 0.004166667, %v157_v23  ;;  %v160_v27 = vmul.f32 0.004166667, %v154_v25  ;;  %v1129_v23 = vld [vmem:[#allocation5 + $0x130] sm:$0xff]   ;;  %v1130_v25 = vld [vmem:[#allocation5 + $0x1b8] sm:$0xff]  }
  0xc1   :  { %1163 = vrsqrt.f32 %v126_v21 }
  0xc2   :  { %v165_v30 = vsub.f32 %v161_v26, %v163_v22  ;;  %v164_v31 = vsub.f32 %v160_v27, %v162_v24  ;;  %v1131_v26 = vld [vmem:[#allocation5 + $0x168] sm:$0xff]  }
  0xc3   :  { %v193_v34 = vpop.xlane.xlu1 %192  ;;  %v190_v35 = vpop.xlane.xlu0 %189  ;;  %v1133_v27 = vld [vmem:[#allocation5 + $0x128] sm:$0xff]  }
  0xc4   :  { %v167_v36 = vmax.f32 %v165_v30, 0.0  ;;  %v166_v37 = vmax.f32 %v164_v31, 0.0  ;;  %v1378_v38 = vmul.f32 0.004166667, %v193_v34  ;;  %v1380_v39 = vmul.f32 0.004166667, %v190_v35 }
  0xc5   :  { %v1158_v41 = vpop.eup %1157  ;;  %v169_v31 = vsub.f32 %v1320_v33, %v1372_v19  ;;  %v1134_v34 = vld [vmem:[#allocation5 + $0x1b0] sm:$0xff]   ;;  %v1135_v35 = vld [vmem:[#allocation5 + $0x160] sm:$0xff]  }
  0xc6   :  { %v173_v43 = vadd.f32 1e-05, %v167_v36  ;;  %v172_v44 = vadd.f32 1e-05, %v166_v37  ;;  %v209_v50 = vmul.f32 %v1378_v38, %v1378_v38  ;;  %v208_v54 = vmul.f32 %v1380_v39, %v1380_v39 }
  0xc7   :  { %v203_v51 = vpop.xlane.xlu1 %202  ;;  %v200_v55 = vpop.xlane.xlu0 %199  ;;  %v85_v8 = vmul.f32 %v1158_v41, %v77_v56  ;;  %v84_v61 = vmul.f32 %v1158_v41, %v76_v42  ;;  %v1136_v41 = vld [vmem:[#allocation5 + $0x1e8] sm:$0xff]   ;;  %v217_v33 = vsub.f32 %v1336_v47, %v1378_v38  ;;  %v1142_v56 = vld [vmem:[#allocation5 + $0x1a0] sm:$0xff]  }
  0xc8   :  { %1165 = vrsqrt.f32 %v173_v43  ;;  %v207_v58 = vmul.f32 0.004166667, %v203_v51  ;;  %v206_v59 = vmul.f32 0.004166667, %v200_v55  ;;  %v1137_v43 = vld [vmem:[#allocation5 + $0x120] sm:$0xff]   ;;  %v1141_v51 = vld [vmem:[#allocation5 + $0x118] sm:$0xff]   ;;  %v215_v55 = vsub.f32 %v1340_v53, %v1380_v39 }
  0xc9   :  { %v1160_v60 = vpop.eup %1159  ;;  %1167 = vrsqrt.f32 %v172_v44  ;;  %v1138_v44 = vld [vmem:[#allocation5 + $0x1a8] sm:$0xff]  }
  0xca   :  { %v211_v62 = vsub.f32 %v207_v58, %v209_v50  ;;  %v210_v63 = vsub.f32 %v206_v59, %v208_v54  ;;  %v87_v0 = vmul.f32 %v1160_v60, %v79_v5  ;;  %v86_v1 = vmul.f32 %v1160_v60, %v78_v48  ;;  %v1139_v48 = vld [vmem:[#allocation5 + $0x158] sm:$0xff]   ;;  %v1140_v50 = vld [vmem:[#allocation5 + $0x1e0] sm:$0xff]   ;;  %v1143_v58 = vld [vmem:[#allocation5 + $0x150] sm:$0xff]  }
  0xcb   :  { %v1144_v5 = vld [vmem:[#allocation5 + $0x1d8] sm:$0xff]   ;;  %v1149_v53 = vld [vmem:[#allocation5 + $0x108] sm:$0xff]  }
  0xcc   :  { %v213_v40 = vmax.f32 %v211_v62, 0.0  ;;  %v212_v7 = vmax.f32 %v210_v63, 0.0  ;;  %v89_v10 = vpack.c.bf16 %v87_v0, %v85_v8  ;;  %v88_v11 = vpack.c.bf16 %v86_v1, %v84_v61  ;;  %v1145_v61 = vld [vmem:[#allocation5 + $0x110] sm:$0xff]   ;;  %v1146_v62 = vld [vmem:[#allocation5 + $0x198] sm:$0xff]   ;;  %v1147_v63 = vld [vmem:[#allocation5 + $0x148] sm:$0xff]  }
  0xcd   :  { %v1162_v9 = vpop.eup %1161  ;;  %v1148_v0 = vld [vmem:[#allocation5 + $0x1d0] sm:$0xff]  }
  0xce   :  { %v1164_v17 = vpop.eup %1163  ;;  %v219_v20 = vadd.f32 1e-05, %v213_v40  ;;  %v218_v21 = vadd.f32 1e-05, %v212_v7  ;;  %779 = vmatprep.mubr.bf16.mxu0 %v89_v10  ;;  %v133_v3 = vmul.f32 %v1162_v9, %v125_v6  ;;  %v132_v22 = vmul.f32 %v1162_v9, %v124_v2  ;;  %v1150_v1 = vld [vmem:[#allocation5 + $0x190] sm:$0xff]   ;;  %v1151_v2 = vld [vmem:[#allocation5 + $0x140] sm:$0xff]  }
  0xcf   :  { %780 = vmatmul.mubr.bf16.vlgmr.msra.gmra.mxu0 %v88_v11  ;;  %v131_v4 = vmul.f32 %v1164_v17, %v123_v13  ;;  %v130_v49 = vmul.f32 %v1164_v17, %v122_v45  ;;  %v1152_v6 = vld [vmem:[#allocation5 + $0x1c8] sm:$0xff]   ;;  %v170_v40 = vsub.f32 %v1314_v28, %v1370_v18  ;;  %v168_v7 = vsub.f32 %v1318_v32, %v1372_v19  ;;  %v1153_v10 = vld [vmem:[#allocation5 + $0x100] sm:$0xff]  }
  0xd0   :  { %1169 = vrsqrt.f32 %v219_v20  ;;  %1041 = vmatpush3.bf16.msra.mxu0 %v1126_v12  ;;  %v1154_v11 = vld [vmem:[#allocation5 + $0x188] sm:$0xff]   ;;  %v1155_v45 = vld [vmem:[#allocation5 + $0x1c0] sm:$0xff]   ;;  %v216_v13 = vsub.f32 %v1334_v46, %v1378_v38 }
  0xd1   :  { %1171 = vrsqrt.f32 %v218_v21  ;;  %v135_v24 = vpack.c.bf16 %v133_v3, %v131_v4  ;;  %1042 = vmatprep.subr.bf16.mxu0 %v1127_v14  ;;  %v134_v15 = vpack.c.bf16 %v132_v22, %v130_v49  ;;  %v214_v14 = vsub.f32 %v1338_v52, %v1380_v39  ;;  %v1156_v18 = vld [vmem:[#allocation5 + $0x180] sm:$0xff]  }
  0xd2   :  { %v931_v39 = vld [vmem:[%s1426_s2] ss:$0 sm:$0xff]  ;;  %s1245_s2 = smov [#allocation7]  }
  0xd3   :  { %820 = vmatprep.mubr.bf16.mxu1 %v135_v24  ;;  %s918_s26 = sshll.u32 %s1245_s2, 4  ;;  %s919_s26 = int_to_ptr.vmem [resolvable:$true] %s918_s26 }
  0xd4   :  { %821 = vmatmul.mubr.bf16.vlgmr.msra.gmra.mxu1 %v134_v15  ;;  %1043 = vmatpush3.bf16.msra.mxu0 %v1129_v23  ;;  %s1213_s27 = scalar_lea.vmem %s919_s26, 256  ;;  %p1218_p11 = scmp.lt.s32.totalorder %s919_s26, %s919_s26 }
  0xd5   :  { %v1166_v30 = vpop.eup %1165  ;;  %1063 = vmatpush3.bf16.msra.mxu1 %v1130_v25  ;;  %1044 = vmatprep.subr.bf16.mxu0 %v1131_v26  ;;  %p1214_p10 = scmp.ne.s32.totalorder %s919_s26, %s1213_s27  ;;  %p1219_p12 = scmp.lt.s32.totalorder %s1213_s27, %s1213_s27 }
  0xd6   :  { %v1168_v36 = vpop.eup %1167  ;;  %1064 = vmatprep.subr.bf16.mxu1 %v1132_v16  ;;  %v179_v37 = vmul.f32 %v1166_v30, %v171_v57  ;;  %v178_v9 = vmul.f32 %v1166_v30, %v170_v40 }
  0xd7   :  { %v177_v42 = vmul.f32 %v1168_v36, %v169_v31  ;;  %v176_v12 = vmul.f32 %v1168_v36, %v168_v7  ;;  %p1220_p13 = por %p1219_p12, %p1218_p11 }
  0xd8   :  { %1045 = vmatpush3.bf16.msra.mxu0 %v1133_v27 }
  0xd9   :  { %1065 = vmatpush3.bf16.msra.mxu1 %v1134_v34  ;;  %1046 = vmatprep.subr.bf16.mxu0 %v1135_v35  ;;  %v181_v29 = vpack.c.bf16 %v179_v37, %v177_v42  ;;  %v180_v28 = vpack.c.bf16 %v178_v9, %v176_v12  ;;  %p1221_p0 = pnand %p1220_p13, %p1214_p10 }
  0xda   :  { %1066 = vmatprep.subr.bf16.mxu1 %v1136_v41 }
  0xdb   :  { %861 = vmatprep.mubr.bf16.mxu0 %v181_v29 }
  0xdc   :  { %1047 = vmatpush3.bf16.msra.mxu0 %v1137_v43 }
  0xdd   :  { %v1170_v54 = vpop.eup %1169  ;;  %1067 = vmatpush3.bf16.msra.mxu1 %v1138_v44  ;;  %1048 = vmatprep.subr.bf16.mxu0 %v1139_v48 }
  0xde   :  { %v1172_v59 = vpop.eup %1171  ;;  %1068 = vmatprep.subr.bf16.mxu1 %v1140_v50  ;;  %v225_v60 = vmul.f32 %v1170_v54, %v217_v33  ;;  %v224_v19 = vmul.f32 %v1170_v54, %v216_v13 }
  0xdf   :  { %v223_v8 = vmul.f32 %v1172_v59, %v215_v55  ;;  %v222_v32 = vmul.f32 %v1172_v59, %v214_v14 }
  0xe0   :  { %1049 = vmatpush3.bf16.msra.mxu0 %v1141_v51 }
  0xe1   :  { %1069 = vmatpush3.bf16.msra.mxu1 %v1142_v56  ;;  %1050 = vmatprep.subr.bf16.mxu0 %v1143_v58  ;;  %v227_v47 = vpack.c.bf16 %v225_v60, %v223_v8  ;;  %v226_v17 = vpack.c.bf16 %v224_v19, %v222_v32 }
  0xe2   :  { %1070 = vmatprep.subr.bf16.mxu1 %v1144_v5 }
  0xe3   :  { %902 = vmatprep.mubr.bf16.mxu1 %v227_v47 }
  0xe4   :  { %1051 = vmatpush3.bf16.msra.mxu0 %v1145_v61 }
  0xe5   :  { %1071 = vmatpush3.bf16.msra.mxu1 %v1146_v62  ;;  %1052 = vmatprep.subr.bf16.mxu0 %v1147_v63 }
  0xe6   :  { %1072 = vmatprep.subr.bf16.mxu1 %v1148_v0 }
  0xe8   :  { %1053 = vmatpush3.bf16.msra.mxu0 %v1149_v53 }
  0xe9   :  { %1073 = vmatpush3.bf16.msra.mxu1 %v1150_v1  ;;  %1054 = vmatprep.subr.bf16.mxu0 %v1151_v2 }
  0xea   :  { %1074 = vmatprep.subr.bf16.mxu1 %v1152_v6 }
  0xec   :  { %1055 = vmatpush3.bf16.msra.mxu0 %v1153_v10 }
  0xed   :  { %1075 = vmatpush3.bf16.msra.mxu1 %v1154_v11 }
  0xee   :  { %1076 = vmatprep.subr.bf16.mxu1 %v1155_v45 }
  0xef   :  { %862 = vmatmul.mubr.bf16.vlgmr.msra.gmra.mxu0 %v180_v28 }
  0xf1   :  { %1077 = vmatpush3.bf16.msra.mxu1 %v1156_v18 }
  0xf4   :  { %903 = vmatmul.mubr.bf16.vlgmr.msra.gmra.mxu1 %v226_v17 }
 0x18f   :  { %v1012_v20 = vpop.f32.mrf.mxu0 }
 0x191   :  { %v1013_v21 = vpop.f32.mrf.mxu0 }
 0x192   :  { %v1014_v49 = vadd.f32 %v1013_v21, %v1012_v20 }
 0x193   :  { %v1015_v22 = vpop.f32.mrf.mxu0 }
 0x194   :  { %v1034_v3 = vpop.f32.mrf.mxu1  ;;  %v782_v25 = vadd.f32 %v1014_v49, %v931_v39 }
 0x195   :  { %v1016_v46 = vpop.f32.mrf.mxu0 }
 0x196   :  { %v1035_v4 = vpop.f32.mrf.mxu1  ;;  %v1017_v26 = vadd.f32 %v1016_v46, %v1015_v22 }
 0x197   :  { %v1036_v23 = vadd.f32 %v1035_v4, %v1034_v3 }
 0x198   :  { %v1037_v38 = vpop.f32.mrf.mxu1  ;;  %v785_v36 = vadd.f32 %v1017_v26, %v931_v39 }
 0x199   :  { %v823_v30 = vadd.f32 %v1036_v23, %v782_v25 }
 0x19a   :  { %v1038_v15 = vpop.f32.mrf.mxu1 }
 0x19b   :  { %v1039_v31 = vadd.f32 %v1038_v15, %v1037_v38 }
 0x19d   :  { %v826_v29 = vadd.f32 %v1039_v31, %v785_v36 }
 0x1af   :  { %v1056_v52 = vpop.f32.mrf.mxu0 }
 0x1b1   :  { %v1057_v24 = vpop.f32.mrf.mxu0 }
 0x1b2   :  { %v1058_v16 = vadd.f32 %v1057_v24, %v1056_v52 }
 0x1b3   :  { %v1059_v57 = vpop.f32.mrf.mxu0 }
 0x1b4   :  { %v1078_v27 = vpop.f32.mrf.mxu1  ;;  %v864_v37 = vadd.f32 %v1058_v16, %v823_v30 }
 0x1b5   :  { %v1060_v34 = vpop.f32.mrf.mxu0 }
 0x1b6   :  { %v1079_v35 = vpop.f32.mrf.mxu1  ;;  %v1061_v41 = vadd.f32 %v1060_v34, %v1059_v57 }
 0x1b7   :  { %v1080_v42 = vadd.f32 %v1079_v35, %v1078_v27 }
 0x1b8   :  { %v1081_v43 = vpop.f32.mrf.mxu1  ;;  %v867_v50 = vadd.f32 %v1061_v41, %v826_v29 }
 0x1b9   :  { %v905_v44 = vadd.f32 %v1080_v42, %v864_v37 }
 0x1ba   :  { %v1082_v48 = vpop.f32.mrf.mxu1 }
 0x1bb   :  { %911 = vst [vmem:[#allocation7] sm:$0xff] %v905_v44  ;;  %v1083_v33 = vadd.f32 %v1082_v48, %v1081_v43 }
 0x1bd   :  { %v908_v51 = vadd.f32 %v1083_v33, %v867_v50 }
 0x1bf   :  { %912 = vst [vmem:[#allocation7 + $0x8] sm:$0xff] %v908_v51 }
 0x1c0   :  { %1224 = shalt.err (!%p1221_p0)
}
 0x1c1   :  { %s1246_s28 = smov 128   ;;  %s1247_s29 = smov 8  }
 0x1c2   :  { %924 = dma.vmem_to_hbm [thread:$0]  %s919_s26, 256, %s1427_s3, [#allocation4], %s1246_s28, %s1246_s28, %s1247_s29  }
 0x1c3   :  { %1237 = dma.done.wait [#allocation4], 256  }
 0x1c4   :  { %1238 = vsyncadd [#allocation4], 4294967040 }
 0x1c5   :  { %928 = vsyncpa [#allocation3], 1 }
 0x1c6   :  { %929 = vsyncpa [#allocation6], 1 }
 0x1c7   :  { %930 = vsyncpa [#allocation4], 1 }

</bundles_post_ra>
